<compile_context>
chip_gen: v5e
topology: v5e:2x2
jax: 0.10.0
libtpu: 0.0.40
codegen_flags: <defaults>
</compile_context>

<pallas_src>
import functools

import jax
import jax.numpy as jnp
from jax.experimental import pallas as pl
from jax.experimental.pallas import tpu as pltpu


def _kd_loss_kernel(student_ref, teacher_ref, targets_ref, out_ref, *,
                    temperature: float, alpha: float, batch_size: int):
    pid = pl.program_id(0)

    s = student_ref[...].astype(jnp.float32)     # (TB, C) raw student logits
    t = teacher_ref[...].astype(jnp.float32)     # (TB, C) raw teacher logits
    tgt = targets_ref[...]                       # (TB, 1) int32 class ids

    TB, C = s.shape
    T = jnp.float32(temperature)
    inv_T = jnp.float32(1.0 / temperature)

    # ---- teacher: softmax(teacher / T) and its log, reusing a single exp pass
    t_t = t * inv_T
    t_max = jnp.max(t_t, axis=1, keepdims=True)
    t_shift = t_t - t_max
    e_t = jnp.exp(t_shift)                                        # EUP pass 1
    sum_t = jnp.sum(e_t, axis=1, keepdims=True)
    soft_targets = e_t * pl.reciprocal(sum_t, approx=False)       # reuse exp
    t_logsm = t_shift - jnp.log(sum_t)

    # ---- student: log_softmax(student / T)
    s_t = s * inv_T
    s_max = jnp.max(s_t, axis=1, keepdims=True)
    s_shift = s_t - s_max
    e_s = jnp.exp(s_shift)                                        # EUP pass 2
    sum_s = jnp.sum(e_s, axis=1, keepdims=True)
    s_logsm = s_shift - jnp.log(sum_s)

    # per-row KL(p_teacher || q_student) at temperature T (batchmean later)
    kl_row = jnp.sum(soft_targets * (t_logsm - s_logsm), axis=1, keepdims=True)

    # ---- cross entropy over raw student logits.
    #      max(s) == T * max(s / T) for T > 0, so reuse the tempered row max.
    c_max = T * s_max
    c_lse = jnp.log(jnp.sum(jnp.exp(s - c_max), axis=1, keepdims=True))  # EUP pass 3
    lane_ids = jax.lax.broadcasted_iota(jnp.int32, (TB, C), 1)
    tgt_logit = jnp.sum(jnp.where(lane_ids == tgt, s, 0.0), axis=1, keepdims=True)
    ce_row = -(tgt_logit - c_max - c_lse)                        # (TB, 1)

    # ---- mask batch-padding rows, reduce, scale, write this tile's partial loss
    row_ids = pid * TB + jax.lax.broadcasted_iota(jnp.int32, (TB, 1), 0)
    valid = row_ids < batch_size
    kl_sum = jnp.sum(jnp.where(valid, kl_row, 0.0))
    ce_sum = jnp.sum(jnp.where(valid, ce_row, 0.0))

    partial = (jnp.float32(alpha) * (T * T) * kl_sum
               + jnp.float32(1.0 - alpha) * ce_sum) / jnp.float32(batch_size)
    out_ref[...] = jnp.broadcast_to(partial, out_ref.shape)


def _choose_block_b(batch_pad: int, num_classes: int, itemsize: int) -> int:
    """Pick a batch tile so 2 inputs x 2 pipeline buffers fit ~8 MiB of VMEM
    (comfortable even under v7x's 64 MiB physical / 32 MiB scoped budget)."""
    c_pad = max(128, ((num_classes + 127) // 128) * 128)
    budget = 8 * 1024 * 1024
    tb = budget // (2 * 2 * c_pad * max(itemsize, 4))
    tb = max(8, min(512, (tb // 8) * 8))
    return min(tb, batch_pad)


def kd_loss(student_outputs, teacher_outputs, targets,
            temperature: float = 3.0, alpha: float = 0.5, block_b=None):
    """Pallas TPU implementation of KnowledgeDistillationLoss.forward."""
    B, C = student_outputs.shape
    b_pad8 = ((B + 7) // 8) * 8
    if block_b is None:
        block_b = _choose_block_b(b_pad8, C, student_outputs.dtype.itemsize)
    block_b = max(8, (block_b // 8) * 8)
    nbt = -(-B // block_b)                  # number of batch tiles
    b_pad = nbt * block_b

    # targets as a tiny int32 column (SMEM refs only allow scalar loads, and the
    # one-hot is built with a vector lane-iota compare, so a small VMEM column wins).
    tgt2d = targets.astype(jnp.int32).reshape(B, 1)
    if b_pad != B:
        pad = b_pad - B
        student_outputs = jnp.pad(student_outputs, ((0, pad), (0, 0)))
        teacher_outputs = jnp.pad(teacher_outputs, ((0, pad), (0, 0)))
        tgt2d = jnp.pad(tgt2d, ((0, pad), (0, 0)))

    kernel = functools.partial(_kd_loss_kernel, temperature=temperature,
                               alpha=alpha, batch_size=B)

    partials = pl.pallas_call(
        kernel,
        out_shape=jax.ShapeDtypeStruct((nbt, 8, 128), jnp.float32),
        grid=(nbt,),
        in_specs=[
            pl.BlockSpec((block_b, C), lambda i: (i, 0)),
            pl.BlockSpec((block_b, C), lambda i: (i, 0)),
            pl.BlockSpec((block_b, 1), lambda i: (i, 0)),
        ],
        out_specs=pl.BlockSpec((1, 8, 128), lambda i: (i, 0, 0)),
        compiler_params=pltpu.CompilerParams(
            dimension_semantics=("parallel",),
            vmem_limit_bytes=32 * 1024 * 1024),
    )(student_outputs, teacher_outputs, tgt2d)

    # sum of per-tile partials (each already scaled by alpha/T^2/(1-alpha)/B)
    return jnp.sum(partials[:, 0, 0])


def _kd_loss_ref(student, teacher, targets, temperature=3.0, alpha=0.5):
    """Pure-JAX reference matching the PyTorch module."""
    T = temperature
    soft_t = jax.nn.softmax(teacher / T, axis=1)
    log_q = jax.nn.log_softmax(student / T, axis=1)
    kl = jnp.sum(soft_t * (jnp.log(soft_t) - log_q)) / student.shape[0]
    log_sm = jax.nn.log_softmax(student, axis=1)
    ce = -jnp.mean(jnp.take_along_axis(log_sm, targets[:, None], axis=1))
    return alpha * kl * T * T + (1.0 - alpha) * ce


if __name__ == "__main__":
    key = jax.random.PRNGKey(0)
    k1, k2, k3 = jax.random.split(key, 3)

    # small shapes: batch=50 (not a multiple of the 16-row tile -> exercises the
    # padding mask), num_classes=160 (not a multiple of 128 -> exercises lane padding)
    B, C = 50, 160
    student = jax.random.normal(k1, (B, C), dtype=jnp.float32)
    teacher = jax.random.normal(k2, (B, C), dtype=jnp.float32)
    targets = jax.random.randint(k3, (B,), 0, C, dtype=jnp.int32)

    loss = kd_loss(student, teacher, targets, temperature=3.0, alpha=0.5,
                   block_b=16)  # 4-tile grid for the small demo
    loss = jax.block_until_ready(loss)

    ref = _kd_loss_ref(student, teacher, targets, temperature=3.0, alpha=0.5)
    assert jnp.allclose(loss, ref, rtol=1e-5, atol=1e-5), (loss, ref)

    print("KERNEL_OK")
</pallas_src>

<mosaic_0001>
module attributes {stable_mosaic.version = 11 : i64} {
  func.func @_kd_loss_kernel(%arg0: i32, %arg1: memref<16x160xf32, #tpu.memory_space<vmem>>, %arg2: memref<16x160xf32, #tpu.memory_space<vmem>>, %arg3: memref<16x1xi32, #tpu.memory_space<vmem>>, %arg4: memref<1x8x128xf32, #tpu.memory_space<vmem>>) attributes {dimension_semantics = [#tpu.dimension_semantics<parallel>], iteration_bounds = array<i64: 4>, scalar_prefetch = 0 : i64, scratch_operands = 0 : i64, tpu.core_type = #tpu.core_type<tc>, window_params = [{transform_indices = @transform_0, window_bounds = array<i64: 16, 160>}, {transform_indices = @transform_1, window_bounds = array<i64: 16, 160>}, {transform_indices = @transform_2, window_bounds = array<i64: 16, 1>}, {transform_indices = @transform_3, window_bounds = array<i64: 1, 8, 128>}]} {
    %c0 = arith.constant 0 : index
    %c0_0 = arith.constant 0 : index
    %0 = vector.load %arg1[%c0, %c0_0] : memref<16x160xf32, #tpu.memory_space<vmem>>, vector<16x160xf32>
    %c0_1 = arith.constant 0 : index
    %c0_2 = arith.constant 0 : index
    %1 = vector.load %arg2[%c0_1, %c0_2] : memref<16x160xf32, #tpu.memory_space<vmem>>, vector<16x160xf32>
    %c0_3 = arith.constant 0 : index
    %c0_4 = arith.constant 0 : index
    %2 = vector.load %arg3[%c0_3, %c0_4] : memref<16x1xi32, #tpu.memory_space<vmem>>, vector<16x1xi32>
    %cst = arith.constant 0.333333343 : f32
    %3 = vector.broadcast %cst : f32 to vector<16x160xf32>
    %4 = arith.mulf %1, %3 : vector<16x160xf32>
    %cst_5 = arith.constant dense<0xFF800000> : vector<16xf32>
    %5 = vector.multi_reduction <maximumf>, %4, %cst_5 [1] : vector<16x160xf32> to vector<16xf32>
    %6 = vector.shape_cast %5 : vector<16xf32> to vector<16x1xf32>
    %7 = vector.broadcast %6 : vector<16x1xf32> to vector<16x160xf32>
    %8 = arith.subf %4, %7 : vector<16x160xf32>
    %9 = math.exp %8 : vector<16x160xf32>
    %cst_6 = arith.constant dense<0.000000e+00> : vector<16xf32>
    %10 = vector.multi_reduction <add>, %9, %cst_6 [1] : vector<16x160xf32> to vector<16xf32>
    %11 = vector.shape_cast %10 : vector<16xf32> to vector<16x1xf32>
    %12 = tpu.reciprocal %11 : vector<16x1xf32> -> vector<16x1xf32>
    %13 = vector.broadcast %12 : vector<16x1xf32> to vector<16x160xf32>
    %14 = arith.mulf %9, %13 : vector<16x160xf32>
    %15 = math.log %11 : vector<16x1xf32>
    %16 = vector.broadcast %15 : vector<16x1xf32> to vector<16x160xf32>
    %17 = arith.subf %8, %16 : vector<16x160xf32>
    %cst_7 = arith.constant 0.333333343 : f32
    %18 = vector.broadcast %cst_7 : f32 to vector<16x160xf32>
    %19 = arith.mulf %0, %18 : vector<16x160xf32>
    %cst_8 = arith.constant dense<0xFF800000> : vector<16xf32>
    %20 = vector.multi_reduction <maximumf>, %19, %cst_8 [1] : vector<16x160xf32> to vector<16xf32>
    %21 = vector.shape_cast %20 : vector<16xf32> to vector<16x1xf32>
    %22 = vector.broadcast %21 : vector<16x1xf32> to vector<16x160xf32>
    %23 = arith.subf %19, %22 : vector<16x160xf32>
    %24 = math.exp %23 : vector<16x160xf32>
    %cst_9 = arith.constant dense<0.000000e+00> : vector<16xf32>
    %25 = vector.multi_reduction <add>, %24, %cst_9 [1] : vector<16x160xf32> to vector<16xf32>
    %26 = vector.shape_cast %25 : vector<16xf32> to vector<16x1xf32>
    %27 = math.log %26 : vector<16x1xf32>
    %28 = vector.broadcast %27 : vector<16x1xf32> to vector<16x160xf32>
    %29 = arith.subf %23, %28 : vector<16x160xf32>
    %30 = arith.subf %17, %29 : vector<16x160xf32>
    %31 = arith.mulf %14, %30 : vector<16x160xf32>
    %cst_10 = arith.constant dense<0.000000e+00> : vector<16xf32>
    %32 = vector.multi_reduction <add>, %31, %cst_10 [1] : vector<16x160xf32> to vector<16xf32>
    %33 = vector.shape_cast %32 : vector<16xf32> to vector<16x1xf32>
    %cst_11 = arith.constant 3.000000e+00 : f32
    %34 = vector.broadcast %cst_11 : f32 to vector<16x1xf32>
    %35 = arith.mulf %34, %21 : vector<16x1xf32>
    %36 = vector.broadcast %35 : vector<16x1xf32> to vector<16x160xf32>
    %37 = arith.subf %0, %36 : vector<16x160xf32>
    %38 = math.exp %37 : vector<16x160xf32>
    %cst_12 = arith.constant dense<0.000000e+00> : vector<16xf32>
    %39 = vector.multi_reduction <add>, %38, %cst_12 [1] : vector<16x160xf32> to vector<16xf32>
    %40 = vector.shape_cast %39 : vector<16xf32> to vector<16x1xf32>
    %41 = math.log %40 : vector<16x1xf32>
    %42 = tpu.iota {dimensions = array<i32: 1>} : vector<16x160xi32>
    %43 = vector.broadcast %2 : vector<16x1xi32> to vector<16x160xi32>
    %44 = arith.cmpi eq, %42, %43 : vector<16x160xi32>
    %cst_13 = arith.constant 0.000000e+00 : f32
    %45 = vector.broadcast %cst_13 : f32 to vector<16x160xf32>
    %46 = arith.select %44, %0, %45 : vector<16x160xi1>, vector<16x160xf32>
    %cst_14 = arith.constant dense<0.000000e+00> : vector<16xf32>
    %47 = vector.multi_reduction <add>, %46, %cst_14 [1] : vector<16x160xf32> to vector<16xf32>
    %48 = vector.shape_cast %47 : vector<16xf32> to vector<16x1xf32>
    %49 = arith.subf %48, %35 : vector<16x1xf32>
    %50 = arith.subf %49, %41 : vector<16x1xf32>
    %cst_15 = arith.constant 0.000000e+00 : f32
    %51 = vector.broadcast %cst_15 : f32 to vector<16x1xf32>
    %52 = arith.subf %51, %50 : vector<16x1xf32>
    %c16_i32 = arith.constant 16 : i32
    %53 = arith.muli %arg0, %c16_i32 : i32
    %54 = tpu.iota {dimensions = array<i32: 0>} : vector<16x1xi32>
    %55 = vector.broadcast %53 : i32 to vector<16x1xi32>
    %56 = arith.addi %55, %54 : vector<16x1xi32>
    %c50_i32 = arith.constant 50 : i32
    %57 = vector.broadcast %c50_i32 : i32 to vector<16x1xi32>
    %58 = arith.cmpi slt, %56, %57 : vector<16x1xi32>
    %cst_16 = arith.constant 0.000000e+00 : f32
    %59 = vector.broadcast %cst_16 : f32 to vector<16x1xf32>
    %60 = arith.select %58, %33, %59 : vector<16x1xi1>, vector<16x1xf32>
    %61 = vector.shape_cast %60 : vector<16x1xf32> to vector<1x16x1xf32>
    %cst_17 = arith.constant dense<0.000000e+00> : vector<1xf32>
    %62 = vector.multi_reduction <add>, %61, %cst_17 [1, 2] : vector<1x16x1xf32> to vector<1xf32>
    %63 = vector.shape_cast %62 : vector<1xf32> to vector<1x1x1xf32>
    %64 = vector.extract %63[0, 0, 0] : f32 from vector<1x1x1xf32>
    %cst_18 = arith.constant 0.000000e+00 : f32
    %65 = vector.broadcast %cst_18 : f32 to vector<16x1xf32>
    %66 = arith.select %58, %52, %65 : vector<16x1xi1>, vector<16x1xf32>
    %67 = vector.shape_cast %66 : vector<16x1xf32> to vector<1x16x1xf32>
    %cst_19 = arith.constant dense<0.000000e+00> : vector<1xf32>
    %68 = vector.multi_reduction <add>, %67, %cst_19 [1, 2] : vector<1x16x1xf32> to vector<1xf32>
    %69 = vector.shape_cast %68 : vector<1xf32> to vector<1x1x1xf32>
    %70 = vector.extract %69[0, 0, 0] : f32 from vector<1x1x1xf32>
    %cst_20 = arith.constant 3.000000e+00 : f32
    %cst_21 = arith.constant 3.000000e+00 : f32
    %71 = arith.mulf %cst_20, %cst_21 : f32
    %cst_22 = arith.constant 5.000000e-01 : f32
    %72 = arith.mulf %cst_22, %71 : f32
    %73 = arith.mulf %72, %64 : f32
    %cst_23 = arith.constant 5.000000e-01 : f32
    %74 = arith.mulf %cst_23, %70 : f32
    %75 = arith.addf %73, %74 : f32
    %cst_24 = arith.constant 5.000000e+01 : f32
    %76 = arith.divf %75, %cst_24 : f32
    %77 = vector.broadcast %76 : f32 to vector<1x8x128xf32>
    %c0_25 = arith.constant 0 : index
    %c0_26 = arith.constant 0 : index
    %c0_27 = arith.constant 0 : index
    %78 = vector.load %arg4[%c0_25, %c0_26, %c0_27] : memref<1x8x128xf32, #tpu.memory_space<vmem>>, vector<1x8x128xf32>
    tpu.vector_store %arg4[%c0_25, %c0_26, %c0_27], %77 {strides = array<i32>} : memref<1x8x128xf32, #tpu.memory_space<vmem>>, vector<1x8x128xf32>,
    return
  }
  func.func @transform_0(%arg0: i32) -> (i32, i32) {
    %c0_i32 = arith.constant 0 : i32
    %c0_i32_0 = arith.constant 0 : i32
    return %arg0, %c0_i32 : i32, i32
  }
  func.func @transform_1(%arg0: i32) -> (i32, i32) {
    %c0_i32 = arith.constant 0 : i32
    %c0_i32_0 = arith.constant 0 : i32
    return %arg0, %c0_i32 : i32, i32
  }
  func.func @transform_2(%arg0: i32) -> (i32, i32) {
    %c0_i32 = arith.constant 0 : i32
    %c0_i32_0 = arith.constant 0 : i32
    return %arg0, %c0_i32 : i32, i32
  }
  func.func @transform_3(%arg0: i32) -> (i32, i32, i32) {
    %c0_i32 = arith.constant 0 : i32
    %c0_i32_0 = arith.constant 0 : i32
    %c0_i32_1 = arith.constant 0 : i32
    return %arg0, %c0_i32, %c0_i32_0 : i32, i32, i32
  }
}

</mosaic_0001>

<bundles_post_ra>
// kernel: tpu_custom_call.1
= control target key start
LH: loop header
LB: loop body
LE: loop exit
PB: predicated region body
PF: predicated region fallthrough
CT: control target
= control target key end

     0   :  { %s1213_s0 = inlined_call_operand.hbm [shape: f32[64,160], index: 0, kind: input, shape index: {}]   ;;  %s1214_s1 = inlined_call_operand.hbm [shape: f32[64,160], index: 1, kind: input, shape index: {}]   ;;  %s1215_s2 = inlined_call_operand.vmem [shape: s32[64,1], index: 2, kind: input, shape index: {}]   ;;  %s1216_s3 = inlined_call_operand.hbm [shape: f32[4,8,128], index: 3, kind: output, shape index: {}]  }
   0x1   :  { %1217 = sst [smem:[#allocation11_spill]] %s1213_s0 }
   0x2   :  { %8 = vsyncpa [#allocation3], 0 }
   0x3   :  { %10 = vsyncpa [#allocation3 + $0x1], 0 }
   0x4   :  { %11 = vsyncpa [#allocation6], 0 }
   0x5   :  { %13 = vsyncpa [#allocation6 + $0x1], 0 }
   0x6   :  { %14 = vsyncpa [#allocation4], 0 }
   0x7   :  { %16 = vsyncpa [#allocation4 + $0x1], 0  ;;  %s915_s12 = smov 0   ;;  %s917_s13 = smov 0  }
   0x8   :  { %s919_s14 = smov 0   ;;  %s921_s15 = smov 0  }
   0x9 LB: > { %s936_s16 = sadd.s32 4294967295, %s889_s15   ;;  %s628_s17 = sadd.s32 4294967294, %s889_s15   ;;  %s889_s15 = sphi %s921_s15, %s1228_s15   ;;  %s885_s14 = sphi %s919_s14, %s1227_s14   ;;  %s881_s13 = sphi %s917_s13, %s1226_s13   ;;  %s877_s12 = sphi %s915_s12, %s1225_s12  }
   0xa   : > { %s940_s18 = sadd.s32 1, %s889_s15   ;;  %s29_s19 = sadd.s32 1, %s885_s14 }
   0xb   : > { %s26_s20 = ssub.s32 %s889_s15, %s940_s18  ;;  %p36_p0 = scmp.ne.s32.totalorder %s885_s14, %s881_s13 }
   0xc   : > { %p27_p1 = scmp.eq.s32.totalorder %s26_s20, 0  ;;  %p37_p2 = scmp.eq.s32.totalorder %s889_s15, 0 }
   0xd   : > { %p42_p3 = scmp.ne.s32.totalorder %s881_s13, %s877_s12  ;;  %p43_p4 = scmp.eq.s32.totalorder %s936_s16, 0 }
   0xe   : > { %s952_s21 = scalar_select %p27_p1, %s885_s14, %s29_s19  }
   0xf   : > { %p954_p5 = por %p37_p2, %p36_p0  ;;  %p958_p6 = por %p43_p4, %p42_p3 }
  0x10   : > { %p118_p7 = scmp.eq.s32.totalorder %s936_s16, 3  ;;  %p124_p8 = scmp.eq.s32.totalorder %s628_s17, 3 }
  0x11   : > { %p677_p9 = scmp.lt.s32.totalorder %s889_s15, 4  ;;  %s973_s26 = sand.u32 1, %s885_s14  }
  0x12   : > { %p964_p10 = por %p118_p7, %p36_p0  ;;  %p968_p11 = por %p124_p8, %p42_p3 }
  0x13   : > { %s651_s27 = sshll.u32 %s889_s15, 5  ;;  %s631_s28 = sshll.u32 %s973_s26, 5 }
  0x14   : > { %s1222_s0 = sld [smem:[#allocation11_spill]]  ;;  %s148_s6 = scalar_lea.vmem [#allocation2], %s631_s28 }
  0x15   : > { %s157_s7 = sshll.u32 %s148_s6, 4  ;;  %p986_p12 = pnand %p677_p9, %p954_p5  ;;  %s158_s7 = int_to_ptr.vmem [resolvable:$true] %s157_s7 }
  0x16   : > { %p639_p13 = scmp.ge.s32.totalorder %s889_s15, 1  ;;  %p197_p0 = scmp.lt.s32.totalorder %s889_s15, 5 }
  0x17   : > { %s145_s9 = scalar_lea.sflag [#allocation3], %s973_s26  ;;  %p763_p2 = pneg %p986_p12 }
  0x1a   : > { %s154_s4 = scalar_lea.hbm %s1222_s0, %s651_s27  ;;  %s766_s20 = scalar_lea.hbm %s1222_s0, 128 }
  0x1b   : > { %s155_s5 = sshll.u32 %s154_s4, 4  ;;  %s156_s5 = int_to_ptr.hbm [resolvable:$true] %s155_s5 }
  0x1c   : > { %s759_s10 = sshra.s32 %s156_s5, 4  ;;  %s760_s10 = int_to_ptr.hbm [resolvable:$true] %s759_s10 }
  0x1d   : > { %s761_s11 = scalar_lea.hbm %s760_s10, 32  ;;  %p767_p5 = scmp.lt.s32.totalorder %s760_s10, %s1222_s0 }
  0x1e   : > { %p762_p1 = scmp.ne.s32.totalorder %s760_s10, %s761_s11  ;;  %p768_p7 = scmp.lt.s32.totalorder %s766_s20, %s761_s11 }
  0x20   : > { %p764_p3 = pnand %p763_p2, %p762_p1  ;;  %p769_p8 = por %p768_p7, %p767_p5 }
  0x22   : > { %p765_p4 = pneg %p764_p3 }
  0x24   : > { %p770_p9 = pnand %p769_p8, %p765_p4 }
  0x26   : > { %773 = shalt.err (!%p770_p9)
}
  0x27   : > { %s891_s30 = smov 256   ;;  %s892_s4 = smov 16  }
  0x28   : > { %669 = dma.hbm_to_vmem [thread:$0]  (!%p986_p12), %s156_s5, 512, %s158_s7, %s145_s9, %s891_s30, %s891_s30, %s892_s4  }
  0x29   : > { %p1010_p1 = pnand %p639_p13, %p197_p0  ;;  %s177_s17 = scalar_lea.hbm %s1214_s1, %s651_s27 }
  0x2a   : > { %s178_s19 = sshll.u32 %s177_s17, 4  ;;  %s171_s20 = scalar_lea.vmem [#allocation5], %s631_s28  ;;  %s179_s19 = int_to_ptr.hbm [resolvable:$true] %s178_s19 }
  0x2b   : > { %s180_s22 = sshll.u32 %s171_s20, 4  ;;  %s168_s29 = scalar_lea.sflag [#allocation6], %s973_s26  ;;  %s181_s22 = int_to_ptr.vmem [resolvable:$true] %s180_s22 }
  0x2c   : > { %s789_s0 = sshra.s32 %s179_s19, 4  ;;  %s796_s10 = scalar_lea.hbm %s1214_s1, 128  ;;  %s790_s0 = int_to_ptr.hbm [resolvable:$true] %s789_s0 }
  0x2d   : > { %s791_s5 = scalar_lea.hbm %s790_s0, 32  ;;  %p797_p4 = scmp.lt.s32.totalorder %s790_s0, %s1214_s1 }
  0x2e   : > { %p792_p3 = scmp.ne.s32.totalorder %s790_s0, %s791_s5  ;;  %p798_p5 = scmp.lt.s32.totalorder %s796_s10, %s791_s5 }
  0x30   : > { %p794_p13 = pnand %p792_p3, %p763_p2  ;;  %p799_p7 = por %p798_p5, %p797_p4 }
  0x32   : > { %p795_p0 = pneg %p794_p13 }
  0x34   : > { %p800_p8 = pnand %p799_p7, %p795_p0 }
  0x36   : > { %803 = shalt.err (!%p800_p8)
}
  0x37   : > { %672 = dma.hbm_to_vmem [thread:$0]  (!%p986_p12), %s179_s19, 512, %s181_s22, %s168_s29, %s891_s30, %s891_s30, %s892_s4  }
  0x38   : > { %201 = sbr.rel (%p1010_p1) target bundleno = 679 (0x2a7), region = 32  ;;  %s1036_s26 = sand.u32 (!%p1010_p1), 1, %s881_s13  }
  0x39   : > { %s640_s28 = sshll.u32 (!%p1010_p1), %s1036_s26, 5  ;;  %s204_s17 = scalar_lea.sflag (!%p1010_p1), [#allocation3], %s1036_s26 }
  0x3a   : > { %s207_s20 = scalar_lea.vmem (!%p1010_p1), [#allocation2], %s640_s28 }
  0x3d   : > { %864 = dma.done.wait (%p958_p6), %s204_s17, 512  }
  0x3e   : > { %866 = vsyncadd (%p958_p6), %s204_s17, 4294966784  ;;  %s214_s0 = scalar_lea.sflag [#allocation6], %s1036_s26  ;;  %s217_s8 = scalar_lea.vmem [#allocation5], %s640_s28 }
  0x3f   : > { %868 = dma.done.wait (%p958_p6), %s214_s0, 512  }
  0x40   : > { %870 = vsyncadd (%p958_p6), %s214_s0, 4294966784  ;;  %v263_v0 = vld [vmem:[%s217_s8] sm:$0xff]  ;;  %v264_v1 = vld [vmem:[%s217_s8 + $0x8] sm:$0xff]  ;;  %vm273_vm0 = vcmask 261120   ;;  %v893_v24 = vmov 0   ;;  %s643_s23 = sshll.u32 %s936_s16, 1 }
  0x41   : > { %v1049_v2 = vld [vmem:[%s207_s20] sm:$0xff]  ;;  %v269_v3 = vmul.f32 0.33333334, %v263_v0  ;;  %v270_v4 = vmul.f32 0.33333334, %v264_v1  ;;  %v1051_v5 = vld [vmem:[%s207_s20 + $0x8] sm:$0xff]  ;;  %716 = vset.pattern.permute.xlu0 %v893_v24  ;;  %715 = vset.pattern.permute.xlu2 %v893_v24  ;;  %v424_v1 = vlaneseq }
  0x42   : > { %v342_v6 = vmul.f32 0.33333334, %v1049_v2  ;;  %v343_v7 = vmul.f32 0.33333334, %v1051_v5  ;;  %v266_v8 = vld [vmem:[%s217_s8 + $0x18] sm:$0xff]  ;;  %v265_v10 = vld [vmem:[%s217_s8 + $0x10] sm:$0xff] }
  0x43   : > { %v274_v9 = vsel %vm273_vm0, %v270_v4, -inf  ;;  %v272_v11 = vmul.f32 0.33333334, %v266_v8  ;;  %v1056_v12 = vld [vmem:[%s207_s20 + $0x18] sm:$0xff]  ;;  %v1059_v15 = vld [vmem:[%s207_s20 + $0x10] sm:$0xff]  ;;  %p254_p6 = scmp.lt.s32.totalorder %s643_s23, 7 }
  0x44   : > { %v275_v13 = vmax.f32 %v269_v3, %v274_v9  ;;  %v346_v14 = vsel %vm273_vm0, %v343_v7, -inf  ;;  %v345_v16 = vmul.f32 0.33333334, %v1056_v12  ;;  %v271_v18 = vmul.f32 0.33333334, %v265_v10  ;;  %s645_s22 = sshll.u32 %s936_s16, 4 }
  0x45   : > { %v347_v17 = vmax.f32 %v342_v6, %v346_v14  ;;  %v278_v19 = vsel %vm273_vm0, %v272_v11, -inf  ;;  %v344_v20 = vmul.f32 0.33333334, %v1059_v15  ;;  %s1230_s23 = smov (!%p254_p6, %s643_s23), 7  ;;  %vm466_vm15 = vcmask 7168   ;;  %s642_s29 = sshll.u32 %s1036_s26, 3 }
  0x46   : > { %276 = vmax.xlane.f32.xlu0 %v275_v13  ;;  %v350_v21 = vsel %vm273_vm0, %v345_v16, -inf  ;;  %v279_v22 = vmax.f32 %v271_v18, %v278_v19  ;;  %s644_s30 = sshll.u32 %s1230_s23, 3  ;;  %s647_s5 = sshll.u32 %s936_s16, 3 }
  0x47   : > { %348 = vmax.xlane.f32.xlu1 %v347_v17  ;;  %v351_v23 = vmax.f32 %v344_v20, %v350_v21  ;;  %s257_s19 = scalar_lea.vmem %s1215_s2, %s644_s30  ;;  %s518_s27 = scalar_lea.hbm %s1216_s3, %s647_s5 }
  0x48   : > { %v268_v61 = vld [vmem:[%s257_s19 + $0x8] sm:$0xff]  ;;  %v267_v62 = vld [vmem:[%s257_s19] sm:$0xff]  ;;  %s250_s0 = scalar_lea.vmem [#allocation7], %s642_s29  ;;  %s522_s30 = sshll.u32 %s518_s27, 4  ;;  %s523_s30 = int_to_ptr.hbm [resolvable:$true] %s522_s30 }
  0x49   : > { %s520_s8 = sshll.u32 %s250_s0, 4  ;;  %s508_s16 = scalar_lea.sflag [#allocation4], %s1036_s26  ;;  %s521_s8 = int_to_ptr.vmem [resolvable:$true] %s520_s8 }
  0x4a   : > { %s833_s6 = sshra.s32 %s523_s30, 4  ;;  %s839_s29 = scalar_lea.hbm %s1216_s3, 32  ;;  %s834_s6 = int_to_ptr.hbm [resolvable:$true] %s833_s6 }
  0x4b   : > { %s835_s19 = scalar_lea.hbm %s834_s6, 8  ;;  %p840_p1 = scmp.lt.s32.totalorder %s834_s6, %s1216_s3 }
  0x4c   : > { %p836_p12 = scmp.ne.s32.totalorder %s834_s6, %s835_s19  ;;  %p841_p3 = scmp.lt.s32.totalorder %s839_s29, %s835_s19 }
  0x4e   : > { %280 = vmax.xlane.f32.xlu0 %v279_v22  ;;  %p837_p2 = pnand %p836_p12, %p964_p10  ;;  %p842_p13 = por %p841_p3, %p840_p1 }
  0x4f   : > { %352 = vmax.xlane.f32.xlu1 %v351_v23 }
  0x50   : > { %p838_p9 = pneg %p837_p2 }
  0x52   : > { %p843_p0 = pnand %p842_p13, %p838_p9 }
  0xb9   : > { %v277_v25 = vpop.xlane.xlu0 %276 }
  0xba   : > { %v1065_v26 = vsub.f32 %v269_v3, %v277_v25  ;;  %v1067_v27 = vsub.f32 %v270_v4, %v277_v25  ;;  %v349_v28 = vpop.xlane.xlu1 %348 }
  0xbb   : > { %v1069_v29 = vsub.f32 %v342_v6, %v349_v28  ;;  %v1071_v30 = vsub.f32 %v343_v7, %v349_v28  ;;  %v1112_v0 = vmul.f32 3.0, %v349_v28  ;;  %v425_v7 = vand.u32 127, %v424_v1 }
  0xbc   : > { %v286_v31 = vmul.f32 1.442695, %v1065_v26  ;;  %v288_v32 = vmul.f32 1.442695, %v1067_v27 }
  0xbd   : > { %v358_v33 = vmul.f32 1.442695, %v1069_v29  ;;  %v360_v34 = vmul.f32 1.442695, %v1071_v30  ;;  %v401_v3 = vsub.f32 %v1051_v5, %v1112_v0  ;;  %v400_v9 = vsub.f32 %v1049_v2, %v1112_v0 }
  0xbe   : > { %717 = vpow2.f32 %v286_v31  ;;  %v426_v14 = vadd.s32 128, %v425_v7 }
  0xbf   : > { %719 = vpow2.f32 %v288_v32  ;;  %v406_v10 = vmul.f32 1.442695, %v401_v3  ;;  %v404_v17 = vmul.f32 1.442695, %v400_v9 }
  0xc0   : > { %721 = vpow2.f32 %v358_v33 }
  0xc1   : > { %723 = vpow2.f32 %v360_v34  ;;  %v281_v35 = vpop.xlane.xlu0 %280 }
  0xc2   : > { %v1077_v36 = vsub.f32 %v271_v18, %v281_v35  ;;  %v1079_v37 = vsub.f32 %v272_v11, %v281_v35  ;;  %v353_v38 = vpop.xlane.xlu1 %352 }
  0xc3   : > { %v1081_v39 = vsub.f32 %v344_v20, %v353_v38  ;;  %v1083_v40 = vsub.f32 %v345_v16, %v353_v38  ;;  %v1121_v8 = vmul.f32 3.0, %v353_v38 }
  0xc4   : > { %v1085_v41 = vpop.eup %717  ;;  %v290_v42 = vmul.f32 1.442695, %v1077_v36  ;;  %v292_v43 = vmul.f32 1.442695, %v1079_v37 }
  0xc5   : > { %v1089_v44 = vpop.eup %719  ;;  %v362_v45 = vmul.f32 1.442695, %v1081_v39  ;;  %v364_v46 = vmul.f32 1.442695, %v1083_v40  ;;  %v403_v16 = vsub.f32 %v1056_v12, %v1121_v8  ;;  %v402_v20 = vsub.f32 %v1059_v15, %v1121_v8 }
  0xc6   : > { %v722_v47 = vpop.eup %721  ;;  %725 = vpow2.f32 %v290_v42  ;;  %v294_v48 = vsel %vm273_vm0, %v1089_v44, 0.0 }
  0xc7   : > { %v724_v49 = vpop.eup %723  ;;  %727 = vpow2.f32 %v292_v43  ;;  %v295_v50 = vadd.f32 %v1085_v41, %v294_v48  ;;  %v410_v22 = vmul.f32 1.442695, %v403_v16  ;;  %v408_v32 = vmul.f32 1.442695, %v402_v20 }
  0xc8   : > { %729 = vpow2.f32 %v362_v45  ;;  %v366_v51 = vsel %vm273_vm0, %v724_v49, 0.0 }
  0xc9   : > { %731 = vpow2.f32 %v364_v46  ;;  %296 = vadd.xlane.f32.xlu2 %v295_v50  ;;  %v367_v52 = vadd.f32 %v722_v47, %v366_v51 }
  0xcb   : > { %368 = vadd.xlane.f32.xlu0 %v367_v52 }
  0xcc   : > { %v1098_v53 = vpop.eup %725 }
  0xcd   : > { %v1100_v54 = vpop.eup %727 }
  0xce   : > { %v730_v55 = vpop.eup %729  ;;  %v298_v56 = vsel %vm273_vm0, %v1100_v54, 0.0 }
  0xcf   : > { %v732_v57 = vpop.eup %731  ;;  %v299_v58 = vadd.f32 %v1098_v53, %v298_v56 }
  0xd0   : > { %v370_v59 = vsel %vm273_vm0, %v732_v57, 0.0 }
  0xd1   : > { %300 = vadd.xlane.f32.xlu2 %v299_v58  ;;  %v371_v60 = vadd.f32 %v730_v55, %v370_v59 }
  0xd3   : > { %372 = vadd.xlane.f32.xlu1 %v371_v60 }
  0xdf   : > { %431 = vperm.xlu0 %716, %v268_v61  }
  0xe9   : > { %428 = vperm.xlu2 %715, %v267_v62  }
 0x13c   : > { %v1109_v63 = vpop.xlane.xlu2 %296 }
 0x13d   : > { %733 = vrcp.f32 %v1109_v63  ;;  %v313_v49 = vand.u32 2147483648, %v1109_v63  ;;  %vm307_vm6 = vweird.f32 %v1109_v63 }
 0x13e   : > { %v369_v13 = vpop.xlane.xlu0 %368 }
 0x13f   : > { %v314_v59 = vor.u32 1.1754944e-38, %v313_v49 }
 0x143   : > { %v1116_v4 = vpop.eup %733 }
 0x144   : > { %v1118_v6 = vpop.xlane.xlu2 %300  ;;  %v303_v11 = vmul.f32 %v1116_v4, %v1109_v63  ;;  %vm308_vm5 = vweird.f32 %v1116_v4 }
 0x145   : > { %735 = vrcp.f32 %v1118_v6  ;;  %vm309_vm7 = vmor %vm307_vm6, %vm308_vm5  ;;  %vm321_vm10 = vweird.f32 %v1118_v6 }
 0x146   : > { %737 = vpow2.f32 %v406_v10  ;;  %v304_v18 = vsub.f32 1.0, %v303_v11  ;;  %v373_v38 = vpop.xlane.xlu1 %372  ;;  %v327_v10 = vand.u32 2147483648, %v1118_v6 }
 0x147   : > { %739 = vlog2.f32 %v1109_v63 }
 0x148   : > { %741 = vlog2.f32 %v369_v13  ;;  %v305_v25 = vmul.f32 %v1116_v4, %v304_v18  ;;  %v325_v13 = vand.u32 2147483647, %v1118_v6 }
 0x149   : > { %743 = vpow2.f32 %v404_v17 }
 0x14a   : > { %745 = vpow2.f32 %v410_v22  ;;  %v306_v45 = vadd.f32 %v1116_v4, %v305_v25  ;;  %v328_v22 = vor.u32 1.1754944e-38, %v327_v10  ;;  %vm326_vm12 = vcmp.eq.f32.partialorder %v325_v13, 8.507059e+37 }
 0x14b   : > { %v1130_v19 = vpop.eup %735  ;;  %747 = vpow2.f32 %v408_v32 }
 0x14c   : > { %v429_v21 = vpop.permute.xlu2 %428  ;;  %v317_v28 = vmul.f32 %v1130_v19, %v1118_v6  ;;  %v738_v34 = vpop.eup %737  ;;  %749 = vlog2.f32 %v1118_v6  ;;  %v310_v56 = vsel %vm309_vm7, %v1116_v4, %v306_v45  ;;  %vm322_vm9 = vweird.f32 %v1130_v19 }
 0x14d   : > { %vm433_vm1 = vcmp.eq.s32.totalorder %v425_v7, %v429_v21  ;;  %vm434_vm2 = vcmp.eq.s32.totalorder %v426_v14, %v429_v21  ;;  %v412_v48 = vsel %vm273_vm0, %v738_v34, 0.0  ;;  %751 = vlog2.f32 %v373_v38  ;;  %vm323_vm11 = vmor %vm321_vm10, %vm322_vm9 }
 0x14e   : > { %v438_v23 = vsel %vm434_vm2, %v1051_v5, 0.0  ;;  %v437_v24 = vsel %vm433_vm1, %v1049_v2, 0.0  ;;  %v740_v5 = vpop.eup %739  ;;  %v318_v2 = vsub.f32 1.0, %v317_v28 }
 0x14f   : > { %v441_v31 = vsel %vm273_vm0, %v438_v23, 0.0  ;;  %v742_v46 = vpop.eup %741 }
 0x150   : > { %v442_v33 = vadd.f32 %v441_v31, %v437_v24  ;;  %v744_v50 = vpop.eup %743  ;;  %v375_v52 = vmul.f32 0.6931472, %v742_v46  ;;  %v319_v55 = vmul.f32 %v1130_v19, %v318_v2 }
 0x151   : > { %v432_v35 = vpop.permute.xlu0 %431  ;;  %v746_v57 = vpop.eup %745  ;;  %v413_v58 = vadd.f32 %v744_v50, %v412_v48 }
 0x152   : > { %vm435_vm3 = vcmp.eq.s32.totalorder %v425_v7, %v432_v35  ;;  %vm436_vm4 = vcmp.eq.s32.totalorder %v426_v14, %v432_v35  ;;  %443 = vadd.xlane.f32.xlu1 %v442_v33  ;;  %v748_v60 = vpop.eup %747  ;;  %v379_v3 = vsub.f32 %v1071_v30, %v375_v52  ;;  %v320_v7 = vadd.f32 %v1130_v19, %v319_v55 }
 0x153   : > { %v440_v42 = vsel %vm436_vm4, %v1056_v12, 0.0  ;;  %v439_v43 = vsel %vm435_vm3, %v1059_v15, 0.0  ;;  %v311_v12 = vand.u32 2147483647, %v1109_v63  ;;  %v335_v15 = vmul.f32 0.6931472, %v740_v5  ;;  %v750_v62 = vpop.eup %749 }
 0x154   : > { %v445_v47 = vsel %vm273_vm0, %v440_v42, 0.0  ;;  %v752_v9 = vpop.eup %751  ;;  %v416_v4 = vsel %vm273_vm0, %v746_v57, 0.0  ;;  %v378_v14 = vsub.f32 %v1069_v29, %v375_v52  ;;  %v337_v16 = vmul.f32 0.6931472, %v750_v62 }
 0x155   : > { %v446_v51 = vadd.f32 %v445_v47, %v439_v43  ;;  %vm312_vm8 = vcmp.eq.f32.partialorder %v311_v12, 8.507059e+37  ;;  %v339_v63 = vsub.f32 %v1067_v27, %v335_v15  ;;  %v338_v27 = vsub.f32 %v1065_v26, %v335_v15 }
 0x156   : > { %v315_v61 = vsel %vm312_vm8, %v314_v59, %v310_v56  ;;  %v377_v17 = vmul.f32 0.6931472, %v752_v9  ;;  %v324_v18 = vsel %vm323_vm11, %v1130_v19, %v320_v7  ;;  %v417_v20 = vadd.f32 %v748_v60, %v416_v4 }
 0x157   : > { %447 = vadd.xlane.f32.xlu2 %v446_v51  ;;  %v331_v11 = vmul.f32 %v1089_v44, %v315_v61  ;;  %v383_v30 = vsub.f32 %v339_v63, %v379_v3  ;;  %v330_v21 = vmul.f32 %v1085_v41, %v315_v61  ;;  %v382_v44 = vsub.f32 %v338_v27, %v378_v14 }
 0x158   : > { %v329_v24 = vsel %vm326_vm12, %v328_v22, %v324_v18  ;;  %v341_v6 = vsub.f32 %v1079_v37, %v337_v16  ;;  %v381_v29 = vsub.f32 %v1083_v40, %v377_v17  ;;  %v380_v19 = vsub.f32 %v1081_v39, %v377_v17 }
 0x159   : > { %v387_v23 = vmul.f32 %v383_v30, %v331_v11  ;;  %v386_v26 = vmul.f32 %v382_v44, %v330_v21  ;;  %v333_v28 = vmul.f32 %v1100_v54, %v329_v24  ;;  %v340_v41 = vsub.f32 %v1077_v36, %v337_v16 }
 0x15a   : > { %414 = vadd.xlane.f32.xlu1 %v413_v58  ;;  %v385_v31 = vsub.f32 %v341_v6, %v381_v29  ;;  %v332_v33 = vmul.f32 %v1098_v53, %v329_v24  ;;  %v457_v36 = vshrl.u32 %v424_v1, 7  ;;  %v459_v43 = vstv %s645_s22 }
 0x15b   : > { %v390_v25 = vsel %vm273_vm0, %v387_v23, 0.0  ;;  %v384_v35 = vsub.f32 %v340_v41, %v380_v19  ;;  %v894_v7 = vmov 50.0  }
 0x15c   : > { %v391_v32 = vadd.f32 %v390_v25, %v386_v26  ;;  %v389_v34 = vmul.f32 %v385_v31, %v333_v28  ;;  %v458_v45 = vadd.s32 8, %v457_v36  ;;  %v460_v48 = vadd.s32 %v459_v43, %v457_v36 }
 0x15d   : > { %v388_v37 = vmul.f32 %v384_v35, %v332_v33 }
 0x15e   : > { %v394_v40 = vsel %vm273_vm0, %v389_v34, 0.0  ;;  %v461_v50 = vadd.s32 %v459_v43, %v458_v45  ;;  %vm462_vm13 = vcmp.lt.s32.totalorder %v460_v48, 50 }
 0x15f   : > { %v395_v5 = vadd.f32 %v394_v40, %v388_v37 }
 0x160   : > { %vm463_vm14 = vcmp.lt.s32.totalorder %v461_v50, 50 }
 0x162   : > { %418 = vadd.xlane.f32.xlu1 %v417_v20 }
 0x16a   : > { %392 = vadd.xlane.f32.xlu1 %v391_v32 }
 0x172   : > { %396 = vadd.xlane.f32.xlu1 %v395_v5 }
 0x1c5   : > { %v444_v2 = vpop.xlane.xlu1 %443 }
 0x1c6   : > { %v449_v53 = vsub.f32 %v444_v2, %v1112_v0 }
 0x1ca   : > { %v448_v47 = vpop.xlane.xlu2 %447 }
 0x1cb   : > { %v450_v51 = vsub.f32 %v448_v47, %v1121_v8 }
 0x1cd   : > { %v415_v38 = vpop.xlane.xlu1 %414 }
 0x1ce   : > { %753 = vlog2.f32 %v415_v38 }
 0x1d4   : > { %v754_v54 = vpop.eup %753 }
 0x1d5   : > { %v421_v39 = vmul.f32 0.6931472, %v754_v54  ;;  %v419_v42 = vpop.xlane.xlu1 %418 }
 0x1d6   : > { %755 = vlog2.f32 %v419_v42 }
 0x1d7   : > { %v451_v46 = vsub.f32 %v449_v53, %v421_v39  ;;  %757 = vrcp.f32 %v894_v7 }
 0x1d9   : > { %v453_v15 = vsub.f32 0.0, %v451_v46 }
 0x1db   : > { %v479_v56 = vsel %vm462_vm13, %v453_v15, 0.0 }
 0x1dc   : > { %v756_v49 = vpop.eup %755  ;;  %v481_v58 = vsel %vm466_vm15, %v479_v56, 0.0 }
 0x1dd   : > { %v423_v12 = vmul.f32 0.6931472, %v756_v49  ;;  %v393_v52 = vpop.xlane.xlu1 %392  ;;  %v758_v9 = vpop.eup %757 }
 0x1de   : > { %v464_v0 = vsel %vm462_vm13, %v393_v52, 0.0  ;;  %v497_v10 = vmul.f32 50.0, %v758_v9  ;;  %vm501_vm0 = vweird.f32 %v758_v9 }
 0x1df   : > { %v452_v55 = vsub.f32 %v450_v51, %v423_v12  ;;  %v467_v63 = vsel %vm466_vm15, %v464_v0, 0.0 }
 0x1e0   : > { %v498_v27 = vsub.f32 1.0, %v497_v10 }
 0x1e1   : > { %v454_v1 = vsub.f32 0.0, %v452_v55 }
 0x1e2   : > { %v499_v20 = vmul.f32 %v758_v9, %v498_v27 }
 0x1e3   : > { %v480_v57 = vsel %vm463_vm14, %v454_v1, 0.0 }
 0x1e4   : > { %v482_v59 = vsel %vm466_vm15, %v480_v57, 0.0  ;;  %v500_v44 = vadd.f32 %v758_v9, %v499_v20 }
 0x1e5   : > { %v397_v60 = vpop.xlane.xlu1 %396  ;;  %v483_v61 = vadd.f32 %v482_v59, %v481_v58 }
 0x1e6   : > { %v465_v62 = vsel %vm463_vm14, %v397_v60, 0.0  ;;  %v502_v26 = vsel %vm501_vm0, %v758_v9, %v500_v44 }
 0x1e7   : > { %v468_v3 = vsel %vm466_vm15, %v465_v62, 0.0  ;;  %484 = vadd.xlane.f32.xlu1 %v483_v61 }
 0x1e8   : > { %v469_v8 = vadd.f32 %v468_v3, %v467_v63 }
 0x1ea   : > { %470 = vadd.xlane.f32.xlu0 %v469_v8 }
 0x25a   : > { %v485_v4 = vpop.xlane.xlu1 %484 }
 0x25b   : > { %v486_v11 = vrot.slane %v485_v4, 4 }
 0x25d   : > { %v487_v13 = vadd.f32 %v486_v11, %v485_v4  ;;  %v471_v14 = vpop.xlane.xlu0 %470 }
 0x25e   : > { %v472_v30 = vrot.slane %v471_v14, 4 }
 0x25f   : > { %v488_v16 = vrot.slane %v487_v13, 2 }
 0x260   : > { %v473_v17 = vadd.f32 %v472_v30, %v471_v14 }
 0x261   : > { %v489_v18 = vadd.f32 %v488_v16, %v487_v13 }
 0x262   : > { %v474_v21 = vrot.slane %v473_v17, 2 }
 0x263   : > { %v490_v23 = vrot.slane %v489_v18, 1 }
 0x264   : > { %v475_v22 = vadd.f32 %v474_v21, %v473_v17 }
 0x265   : > { %v491_v29 = vadd.f32 %v490_v23, %v489_v18 }
 0x266   : > { %v476_v24 = vrot.slane %v475_v22, 1 }
 0x268   : > { %v477_v6 = vadd.f32 %v476_v24, %v475_v22 }
 0x26a   : > { %654 = vpush %v477_v6 }
 0x26b   : > { %656 = vpush %v491_v29 }
 0x26c   : > { %658 = vpush %v502_v26 }
 0x29b   : > { %s655_s7 = spop %654 }
 0x29c   : > { %s493_s11 = smul.f32 4.5, %s655_s7  ;;  %s657_s28 = spop %656 }
 0x29d   : > { %s494_s17 = smul.f32 0.5, %s657_s28  ;;  %s659_s20 = spop %658 }
 0x29f   : > { %s495_s23 = sadd.f32 %s494_s17, %s493_s11 }
 0x2a1   : > { %s504_s4 = smul.f32 %s659_s20, %s495_s23 }
 0x2a3   : > { %v505_v25 = vstv %s504_s4 }
 0x2a4   : > { %506 = vst [vmem:[%s250_s0] sm:$0xff] %v505_v25 }
 0x2a5   : > { %846 = shalt.err (!%p843_p0)
}
 0x2a6   : > { %664 = dma.vmem_to_hbm [thread:$0]  (%p964_p10), %s521_s8, 128, %s523_s30, %s508_s16  }
 0x2a7 PF: > { %p678_p4 = scmp.ge.s32.totalorder %s889_s15, 2  ;;  %s534_s26 = sand.u32 1, %s877_s12  }
 0x2a8   : > { %s535_s10 = scalar_lea.sflag [#allocation4], %s534_s26 }
 0x2a9   : > { %p674_p5 = pnand %p678_p4, %p968_p11 }
 0x2ab   : > { %p675_p7 = pneg %p674_p5 }
 0x2ad   : > { %872 = dma.done.wait (%p675_p7), %s535_s10, 128  }
 0x2ae   : > { %874 = vsyncadd (%p675_p7), %s535_s10, 4294967168  ;;  %p19_p8 = scmp.ge.s32.totalorder %s940_s18, 6   ;;  %s1225_s12 = smov %s881_s13 }
 0x2af   : > { %s1226_s13 = smov %s885_s14  ;;  %s1227_s14 = smov %s952_s21 }
 0x2b0   : > { %s1228_s15 = smov %s940_s18  ;;  %21 = sbr.rel (!%p19_p8) target bundleno = 9 (0x9), region = 93 }
 0x2b5   :  { %541 = vsyncpa [#allocation3], 1 }
 0x2b6   :  { %543 = vsyncpa [#allocation3 + $0x1], 1 }
 0x2b7   :  { %544 = vsyncpa [#allocation6], 1 }
 0x2b8   :  { %546 = vsyncpa [#allocation6 + $0x1], 1 }
 0x2b9   :  { %547 = vsyncpa [#allocation4], 1 }
 0x2ba   :  { %549 = vsyncpa [#allocation4 + $0x1], 1 }

</bundles_post_ra>
